<compile_context>
chip_gen: v6e
topology: v6e:2x2x1
jax: 0.10.0
libtpu: 0.0.40
codegen_flags: <defaults>
</compile_context>

<pallas_src>
import jax
import jax.numpy as jnp
from jax.experimental import pallas as pl
from jax.experimental.pallas import tpu as pltpu


# ---------------------------------------------------------------------------
# Fused kernel: one batch per grid step.
#   patches_ref : (1, NP+1, K)  row 0 is all-zero (CLS slot), rows 1.. are patches
#   w_ref       : (K, E)        conv weight, already (in, out) layout
#   add_ref     : (NP+1, E)     row 0 = cls + pos[0]; row i>0 = conv_bias + pos[i]
#   o_ref       : (1, NP+1, E)
# ---------------------------------------------------------------------------
def _patch_embed_kernel(patches_ref, w_ref, add_ref, o_ref):
    tokens = jnp.dot(
        patches_ref[0], w_ref[...], preferred_element_type=jnp.float32
    )                                # (NP+1, E); row 0 is zeros
    o_ref[0] = (tokens + add_ref[...]).astype(o_ref.dtype)


# ---------------------------------------------------------------------------
# Wrapper
# ---------------------------------------------------------------------------
def _extract_patches(x, patch_size):
    """im2col for a stride==kernel conv: (B,C,H,W) -> (B, NP, C*P*P)."""
    B, C, H, W = x.shape
    P = patch_size
    nh, nw = H // P, W // P
    x = x.reshape(B, C, nh, P, nw, P)
    x = jnp.transpose(x, (0, 2, 4, 1, 3, 5))         # (B, nh, nw, C, P, P)
    return x.reshape(B, nh * nw, C * P * P)


def patch_embedding_forward(x, w_conv, b_conv, cls_token, positions, patch_size):
    B, C, H, W = x.shape
    P = patch_size
    E = w_conv.shape[0]
    NP = (H // P) * (W // P)
    K = C * P * P
    S = NP + 1                                        # sequence length incl. CLS

    # Layout plumbing (wrapper side): patches with a zero CLS row prepended.
    patches = _extract_patches(x, P)                  # (B, NP, K)
    patches_ext = jnp.pad(patches, ((0, 0), (1, 0), (0, 0)))  # (B, S, K)

    # Conv weight (E, C, P, P) -> (K, E), same (c, i, j) flatten order as patches.
    w2d = jnp.transpose(w_conv.reshape(E, K), (1, 0)).astype(jnp.float32)

    # Per-token additive table folding conv bias, CLS token and position embed.
    add = positions + jnp.concatenate(
        [cls_token.reshape(1, E),
         jnp.broadcast_to(b_conv[None, :], (NP, E))], axis=0)   # (S, E)

    return pl.pallas_call(
        _patch_embed_kernel,
        out_shape=jax.ShapeDtypeStruct((B, S, E), jnp.float32),
        grid=(B,),
        in_specs=[
            pl.BlockSpec((1, S, K), lambda b: (b, 0, 0)),
            pl.BlockSpec((K, E), lambda b: (0, 0)),
            pl.BlockSpec((S, E), lambda b: (0, 0)),
        ],
        out_specs=pl.BlockSpec((1, S, E), lambda b: (b, 0, 0)),
        compiler_params=pltpu.CompilerParams(
            dimension_semantics=("parallel",)),
    )(patches_ext, w2d, add)


# ---------------------------------------------------------------------------
# Pure-JAX reference (independent path via lax.conv) for correctness check.
# ---------------------------------------------------------------------------
def reference(x, w_conv, b_conv, cls_token, positions, patch_size):
    B = x.shape[0]
    E = w_conv.shape[0]
    y = jax.lax.conv_general_dilated(
        x, w_conv, window_strides=(patch_size, patch_size), padding="VALID",
        dimension_numbers=("NCHW", "OIHW", "NCHW"))
    y = y + b_conv[None, :, None, None]               # (B, E, h, w)
    _, _, h, w = y.shape
    y = jnp.transpose(y.reshape(B, E, h * w), (0, 2, 1))   # (B, NP, E)
    cls = jnp.broadcast_to(cls_token, (B, 1, E))
    y = jnp.concatenate([cls, y], axis=1)             # (B, NP+1, E)
    return y + positions


# ---------------------------------------------------------------------------
if __name__ == "__main__":
    # Small shapes consistent with the module (scaled-down ViT patch embed).
    B, C, H, W = 2, 4, 16, 16
    P, E = 4, 32
    NP = (H // P) * (W // P)                          # 16 patches -> seq 17

    key = jax.random.PRNGKey(0)
    kx, kw, kb, kc, kp = jax.random.split(key, 5)

    x = jax.random.normal(kx, (B, C, H, W), dtype=jnp.float32)
    # Parameters (cls_token / positions are module parameters in the reference).
    w_conv = jax.random.normal(kw, (E, C, P, P), dtype=jnp.float32) * 0.05
    b_conv = jax.random.normal(kb, (E,), dtype=jnp.float32) * 0.05
    cls_token = jax.random.normal(kc, (1, 1, E), dtype=jnp.float32)
    positions = jax.random.normal(kp, (NP + 1, E), dtype=jnp.float32)

    out = patch_embedding_forward(x, w_conv, b_conv, cls_token, positions, P)
    out = jax.block_until_ready(out)

    ref = reference(x, w_conv, b_conv, cls_token, positions, P)
    assert out.shape == (B, NP + 1, E), out.shape
    assert jnp.allclose(out, ref, atol=1e-4, rtol=1e-4), "mismatch vs reference"

    print("KERNEL_OK")
</pallas_src>

<mosaic_0001>
module attributes {stable_mosaic.version = 11 : i64} {
  func.func @_patch_embed_kernel(%arg0: i32, %arg1: memref<1x17x64xf32, #tpu.memory_space<vmem>>, %arg2: memref<64x32xf32, #tpu.memory_space<vmem>>, %arg3: memref<17x32xf32, #tpu.memory_space<vmem>>, %arg4: memref<1x17x32xf32, #tpu.memory_space<vmem>>) attributes {dimension_semantics = [#tpu.dimension_semantics<parallel>], iteration_bounds = array<i64: 2>, scalar_prefetch = 0 : i64, scratch_operands = 0 : i64, tpu.core_type = #tpu.core_type<tc>, window_params = [{transform_indices = @transform_0, window_bounds = array<i64: 1, 17, 64>}, {pipeline_mode = #tpu.pipeline_mode<synchronous>, transform_indices = @transform_1, window_bounds = array<i64: 64, 32>}, {pipeline_mode = #tpu.pipeline_mode<synchronous>, transform_indices = @transform_2, window_bounds = array<i64: 17, 32>}, {transform_indices = @transform_3, window_bounds = array<i64: 1, 17, 32>}]} {
    %c0 = arith.constant 0 : index
    %c0_0 = arith.constant 0 : index
    %c0_1 = arith.constant 0 : index
    %0 = vector.load %arg1[%c0, %c0_0, %c0_1] : memref<1x17x64xf32, #tpu.memory_space<vmem>>, vector<1x17x64xf32>
    %1 = vector.shape_cast %0 : vector<1x17x64xf32> to vector<17x64xf32>
    %c0_2 = arith.constant 0 : index
    %c0_3 = arith.constant 0 : index
    %2 = vector.load %arg2[%c0_2, %c0_3] : memref<64x32xf32, #tpu.memory_space<vmem>>, vector<64x32xf32>
    %cst = arith.constant dense<0.000000e+00> : vector<17x32xf32>
    %3 = tpu.matmul %1, %2, %cst {dimension_numbers = #tpu.dot_dimension_numbers<[1], [0], [0], [1], [0, 0, 1, 1], [], []>} : vector<17x64xf32>, vector<64x32xf32>, vector<17x32xf32> -> vector<17x32xf32>
    %c0_4 = arith.constant 0 : index
    %c0_5 = arith.constant 0 : index
    %4 = vector.load %arg3[%c0_4, %c0_5] : memref<17x32xf32, #tpu.memory_space<vmem>>, vector<17x32xf32>
    %5 = arith.addf %3, %4 : vector<17x32xf32>
    %c0_6 = arith.constant 0 : index
    %c0_7 = arith.constant 0 : index
    %c0_8 = arith.constant 0 : index
    %6 = vector.load %arg4[%c0_6, %c0_7, %c0_8] : memref<1x17x32xf32, #tpu.memory_space<vmem>>, vector<1x17x32xf32>
    %7 = vector.shape_cast %6 : vector<1x17x32xf32> to vector<17x32xf32>
    %8 = vector.shape_cast %5 : vector<17x32xf32> to vector<1x17x32xf32>
    tpu.vector_store %arg4[%c0_6, %c0_7, %c0_8], %8 {strides = array<i32>} : memref<1x17x32xf32, #tpu.memory_space<vmem>>, vector<1x17x32xf32>,
    return
  }
  func.func @transform_0(%arg0: i32) -> (i32, i32, i32) {
    %c0_i32 = arith.constant 0 : i32
    %c0_i32_0 = arith.constant 0 : i32
    %c0_i32_1 = arith.constant 0 : i32
    return %arg0, %c0_i32, %c0_i32_0 : i32, i32, i32
  }
  func.func @transform_1(%arg0: i32) -> (i32, i32) {
    %c0_i32 = arith.constant 0 : i32
    %c0_i32_0 = arith.constant 0 : i32
    %c0_i32_1 = arith.constant 0 : i32
    return %c0_i32, %c0_i32_0 : i32, i32
  }
  func.func @transform_2(%arg0: i32) -> (i32, i32) {
    %c0_i32 = arith.constant 0 : i32
    %c0_i32_0 = arith.constant 0 : i32
    %c0_i32_1 = arith.constant 0 : i32
    return %c0_i32, %c0_i32_0 : i32, i32
  }
  func.func @transform_3(%arg0: i32) -> (i32, i32, i32) {
    %c0_i32 = arith.constant 0 : i32
    %c0_i32_0 = arith.constant 0 : i32
    %c0_i32_1 = arith.constant 0 : i32
    return %arg0, %c0_i32, %c0_i32_0 : i32, i32, i32
  }
}

</mosaic_0001>

<bundles_post_ra>
// kernel: tpu_custom_call.1
= control target key start
LH: loop header
LB: loop body
LE: loop exit
PB: predicated region body
PF: predicated region fallthrough
CT: control target
= control target key end

     0   :  { %s440_s12 = smov 0   ;;  %s497_s0 = inlined_call_operand.vmem [shape: f32[2,17,64], index: 0, kind: input, shape index: {}]   ;;  %s498_s1 = inlined_call_operand.vmem [shape: f32[64,32], index: 1, kind: input, shape index: {}]   ;;  %s499_s2 = inlined_call_operand.vmem [shape: f32[17,32], index: 2, kind: input, shape index: {}]   ;;  %s500_s3 = inlined_call_operand.vmem [shape: f32[2,17,32], index: 3, kind: output, shape index: {}]  }
   0x1 LB: > { %s335_s13 = sadd.s32 4294967295, %s416_s12   ;;  %p339_p0 = scmp.ge.s32.totalorder %s416_s12, 1  ;;  %s416_s12 = sphi %s440_s12, %s13_s12  }
   0x2   : > { %p137_p1 = scmp.lt.s32.totalorder %s416_s12, 3 }
   0x4   : > { %p138_p2 = pnand %p339_p0, %p137_p1 }
   0x5   : > { %p161_p3 = scmp.lt.s32.totalorder (!%p138_p2), %s335_s13, 1 }
   0x6   : > { %141 = sbr.rel (%p138_p2) target bundleno = 228 (0xe4), region = 32 }
   0xb   : > { %v181_v0 = vld [vmem:[%s498_s1 + $0x38] sm:$0xff]  ;;  %v418_v1 = vmov 0.0   ;;  %v180_v2 = vld [vmem:[%s498_s1 + $0x30] sm:$0xff]  ;;  %v179_v3 = vld [vmem:[%s498_s1 + $0x28] sm:$0xff]  ;;  %s502_s13 = smov (!%p161_p3, %s335_s13), 1  ;;  %vm185_vm0 = vcmask 523264  }
   0xc   : > { %383 = vmatprep.subr.mxu1 %v418_v1  ;;  %358 = vmatprep.subr.mxu0 %v418_v1  ;;  %v178_v4 = vld [vmem:[%s498_s1 + $0x20] sm:$0xff]  ;;  %v177_v5 = vld [vmem:[%s498_s1 + $0x18] sm:$0xff]  ;;  %s399_s24 = smul.u32 24, %s502_s13  ;;  %v176_v6 = vld [vmem:[%s498_s1 + $0x10] sm:$0xff]  ;;  %vm419_vm1 = vmmov 0   ;;  %vm275_vm2 = vcmask 261120  }
   0xd   : > { %391 = vmatpush3.msra.mxu1 %v181_v0  ;;  %359 = vmatpush3.msra.mxu0 %v181_v0  ;;  %v175_v7 = vld [vmem:[%s498_s1 + $0x8] sm:$0xff]  ;;  %v174_v8 = vld [vmem:[%s498_s1] sm:$0xff]  ;;  %v184_v18 = vld [vmem:[%s499_s2 + $0x10] sm:$0x1]  ;;  %vm278_vm3 = vcmask 253952  }
   0xe   : > { %384 = vmatprep.subr.mxu1 %v418_v1  ;;  %360 = vmatprep.subr.mxu0 %v418_v1  ;;  %s165_s4 = scalar_lea.vmem %s497_s0, %s399_s24  ;;  %v183_v12 = vld [vmem:[%s499_s2 + $0x8] sm:$0xff]  ;;  %s170_s11 = scalar_lea.vmem %s500_s3, %s399_s24  ;;  %v182_v14 = vld [vmem:[%s499_s2] sm:$0xff] }
   0xf   : > { %392 = vmatpush3.msra.mxu1 %v180_v2  ;;  %361 = vmatpush3.msra.mxu0 %v180_v2  ;;  %v172_v9 = vld [vmem:[%s165_s4 + $0x8] sm:$0xff]  ;;  %v171_v10 = vld [vmem:[%s165_s4] sm:$0xff]  ;;  %v173_v11 = vld [vmem:[%s165_s4 + $0x10] sm:$0x1] }
  0x10   : > { %385 = vmatprep.subr.mxu1 %v418_v1  ;;  %362 = vmatprep.subr.mxu0 %v418_v1 }
  0x11   : > { %393 = vmatpush3.msra.mxu1 %v179_v3  ;;  %363 = vmatpush3.msra.mxu0 %v179_v3 }
  0x12   : > { %386 = vmatprep.subr.mxu1 %v418_v1  ;;  %364 = vmatprep.subr.mxu0 %v418_v1 }
  0x13   : > { %394 = vmatpush3.msra.mxu1 %v178_v4  ;;  %365 = vmatpush3.msra.mxu0 %v178_v4 }
  0x14   : > { %387 = vmatprep.subr.mxu1 %v418_v1  ;;  %366 = vmatprep.subr.mxu0 %v418_v1 }
  0x15   : > { %395 = vmatpush3.msra.mxu1 %v177_v5  ;;  %367 = vmatpush3.msra.mxu0 %v177_v5 }
  0x16   : > { %388 = vmatprep.subr.mxu1 %v418_v1  ;;  %368 = vmatprep.subr.mxu0 %v418_v1 }
  0x17   : > { %396 = vmatpush3.msra.mxu1 %v176_v6  ;;  %369 = vmatpush3.msra.mxu0 %v176_v6 }
  0x18   : > { %389 = vmatprep.subr.mxu1 %v418_v1  ;;  %370 = vmatprep.subr.mxu0 %v418_v1 }
  0x19   : > { %397 = vmatpush3.msra.mxu1 %v175_v7  ;;  %371 = vmatpush3.msra.mxu0 %v175_v7 }
  0x1a   : > { %390 = vmatprep.subr.mxu1 %v418_v1  ;;  %377 = vmatprep.mubr.msk.f32.mxu1 %vm419_vm1, %v418_v1 }
  0x1b   : > { %398 = vmatpush3.msra.mxu1 %v174_v8  ;;  %372 = vmatprep.subr.mxu0 %v418_v1 }
  0x1c   : > { %378 = vmatmul.mubr.msk.f32.vlgmr.msra.gmra.mxu1 %vm185_vm0, %v172_v9  ;;  %373 = vmatpush3.msra.mxu0 %v174_v8 }
  0x1d   : > { %374 = vmatprep.mubr.msk.f32.mxu0 %vm419_vm1, %v418_v1  ;;  %380 = vmatprep.mubr.msk.f32.mxu1 %vm419_vm1, %v418_v1 }
  0x1e   : > { %375 = vmatmul.mubr.msk.f32.vlgmr.msra.gmra.mxu0 %vm185_vm0, %v171_v10 }
  0x20   : > { %381 = vmatmul.mubr.msk.f32.gmra.mxu1 %vm185_vm0, %v173_v11 }
  0xdc   : > { %v266_v13 = vpop.f32.mrf.mxu1 }
  0xdd   : > { %v267_v15 = vadd.f32 %v266_v13, %v183_v12 }
  0xde   : > { %v261_v16 = vpop.f32.mrf.mxu0  ;;  %v379_v17 = vpop.f32.mrf.mxu1 }
  0xdf   : > { %277 = vst.msk [vmem:[%s170_s11 + $0x8] sm:$0xff] %vm275_vm2, %v267_v15  ;;  %v262_v19 = vadd.f32 %v261_v16, %v182_v14 }
  0xe0   : > { %v376_v20 = vpop.f32.mrf.mxu0  ;;  %v271_v21 = vpop.f32.mrf.mxu1 }
  0xe1   : > { %276 = vst.msk [vmem:[%s170_s11] sm:$0xff] %vm275_vm2, %v262_v19  ;;  %v272_v22 = vadd.f32 %v271_v21, %v184_v18 }
  0xe2   : > { %v382_v23 = vpop.f32.mrf.mxu1 }
  0xe3   : > { %279 = vst.msk [vmem:[%s170_s11 + $0x10] sm:$0x1] %vm278_vm3, %v272_v22 }
  0xe4 PF: > { %s13_s12 = sadd.s32 1, %s416_s12  }
  0xe5   : > { %p10_p4 = scmp.ge.s32.totalorder %s13_s12, 4  }
  0xe7   :  { %12 = sbr.rel (!%p10_p4) target bundleno = 1 (0x1), region = 62 }

</bundles_post_ra>
